<compile_context>
chip_gen: v5e
topology: v5e:2x2
jax: 0.10.0
libtpu: 0.0.40
codegen_flags: <defaults>
</compile_context>

<pallas_src>
import math
from functools import partial

import jax
import jax.numpy as jnp
from jax.experimental import pallas as pl
from jax.experimental.pallas import tpu as pltpu


def conv_identity_params(in_spatial, desired_kernel):
    """Mirror util.conv_identity_params: largest odd kernel <= desired so a stride-1
    convolution preserves spatial size, plus matching padding."""
    k = min(desired_kernel, in_spatial)
    if k % 2 == 0:
        k = max(1, k - 1)
    pad = (k - 1) // 2
    return k, pad


# ---------------------------------------------------------------------------
# Pallas kernel: fused im2col conv + per-tile std statistics
# ---------------------------------------------------------------------------

def _fused_conv_stats_kernel(w_ref, x_ref, mask_ref, res_ref, stats_ref, acc_ref,
                             *, k, wp, tm, cout):
    """One (Cout, TM) output tile.

    w_ref    : (k*k, Cout, Cin) bf16   |conv| taps, (i, j) major
    x_ref    : (1, Cin, TIN)    bf16   padded-image columns for this tile + halo
    mask_ref : (1, TM)          bf16   1.0 on valid output columns, 0.0 on garbage
    res_ref  : (Cout, TM)       bf16   un-normalized conv result (padded-stride layout)
    stats_ref: (8, 128)         f32    rows 0/1/2 = (masked sum, centered m2, count)
    acc_ref  : (Cout, TM)       f32    VMEM scratch accumulator
    """
    # Fused im2col: k*k shifted (Cout, Cin) @ (Cin, TM) matmuls, f32 MXU accumulation.
    for s in range(k * k):
        i, j = divmod(s, k)
        off = i * wp + j                                    # constant flat shift
        xin = x_ref[0, :, pl.ds(off, tm)]                   # (Cin, TM) bf16
        contrib = jnp.dot(w_ref[s], xin, preferred_element_type=jnp.float32)
        if s == 0:
            acc_ref[...] = contrib
        else:
            acc_ref[...] += contrib

    res = acc_ref[...]                                      # (Cout, TM) f32
    res_ref[...] = res.astype(res_ref.dtype)                # bf16 writeback (halved)

    # Per-tile masked, *centered* statistics (exact Chan combine happens on the host).
    # Every tile contains padded-stride garbage columns, so the mask cannot be gated
    # to the last tile only; it is streamed as a cheap bf16 (1, TM) input instead.
    m = mask_ref[...].astype(jnp.float32)                   # (1, TM)
    cnt = jnp.sum(m) * cout
    s1 = jnp.sum(res * m)
    mu = s1 / jnp.maximum(cnt, 1.0)
    d = (res - mu) * m
    m2 = jnp.sum(d * d)

    row = jax.lax.broadcasted_iota(jnp.int32, (8, 128), 0)
    stats_ref[...] = jnp.where(row == 0, s1,
                     jnp.where(row == 1, m2,
                     jnp.where(row == 2, cnt, 0.0)))


# ---------------------------------------------------------------------------
# Host glue
# ---------------------------------------------------------------------------

def _choose_tm(cin, cout, m_full, *, cap=16384, vmem_budget=24 * 1024 * 1024):
    """M-tile width: multiple of 128, large enough that a grid step is bandwidth-
    (not step-overhead-) bound, under a conservative double-buffered VMEM budget."""
    # Per-column VMEM: double-buffered bf16 input/mask/result streams + f32 accumulator.
    per_col = 2 * (2 * cin + 2 + 2 * cout) + 4 * cout
    tm = (vmem_budget // per_col) // 128 * 128
    tm = int(max(512, min(tm, cap)))
    return int(min(tm, pl.cdiv(m_full, 128) * 128))


@partial(jax.jit, static_argnames=("kernel_size", "pad", "tm"))
def weighted_convolution_forward(x, conv_weight, out_edge, *, kernel_size, pad, tm=None):
    """x: (N, Cin, H, W) f32; conv_weight: (Cout, Cin, k, k) f32; out_edge: (1,) f32."""
    N, Cin, H, W = x.shape
    Cout = conv_weight.shape[0]
    k = kernel_size
    p = pad
    Hp, Wp = H + 2 * p, W + 2 * p
    L = N * Hp * Wp                               # output columns in padded-stride layout
    SH = (k - 1) * Wp + (k - 1)                   # largest flat shift (bottom-right tap)

    TM = _choose_tm(Cin, Cout, L) if tm is None else int(tm)
    assert TM % 128 == 0, "M-tile must be a multiple of 128 (lane width)"
    assert TM >= pl.cdiv(SH, 128) * 128, "M-tile too small for the conv halo"
    G = pl.cdiv(L, TM)
    M_pad = G * TM
    TIN = TM + pl.cdiv(SH, 128) * 128             # input tile incl. halo, lane-rounded

    # ---- host glue (no 9x im2col): padded bf16 image stream, channel-major flat ----
    xt = jnp.transpose(x, (1, 0, 2, 3))                                   # (Cin,N,H,W)
    xflat = jnp.pad(xt, ((0, 0), (0, 0), (p, p), (p, p))).reshape(Cin, L)
    xflat = jnp.pad(xflat.astype(jnp.bfloat16), ((0, 0), (0, (G + 1) * TM - L)))
    main = xflat[:, :G * TM].reshape(Cin, G, TM)                          # tile bodies
    halo = xflat[:, TM:(G + 1) * TM].reshape(Cin, G, TM)[:, :, :TIN - TM]  # tiny halos
    xslab = jnp.concatenate([main, halo], axis=2).transpose(1, 0, 2)      # (G,Cin,TIN)

    # |W| taps, (i, j) major, bf16
    w_taps = jnp.abs(conv_weight).transpose(2, 3, 0, 1).reshape(k * k, Cout, Cin)
    w_taps = w_taps.astype(jnp.bfloat16)

    # Validity mask over the padded-stride layout (h < H, w < W, real columns only).
    valid = jnp.zeros((Hp, Wp), jnp.bfloat16).at[:H, :W].set(1)
    mask = jnp.tile(valid.reshape(-1), N)
    mask = jnp.pad(mask, (0, M_pad - L)).reshape(1, M_pad)

    cparams = pltpu.CompilerParams(
        dimension_semantics=("parallel",),
        vmem_limit_bytes=32 * 1024 * 1024,        # keep <= v7x scoped default
    )

    # ---- single fused pass: conv + bf16 result + per-tile partial std stats ----
    res_pad, stats = pl.pallas_call(
        partial(_fused_conv_stats_kernel, k=k, wp=Wp, tm=TM, cout=Cout),
        grid=(G,),
        in_specs=[
            pl.BlockSpec((k * k, Cout, Cin), lambda m: (0, 0, 0)),   # |W| taps (resident)
            pl.BlockSpec((1, Cin, TIN), lambda m: (m, 0, 0)),        # image tile + halo
            pl.BlockSpec((1, TM), lambda m: (0, m)),                 # validity mask
        ],
        out_specs=[
            pl.BlockSpec((Cout, TM), lambda m: (0, m)),              # lane-dense result
            pl.BlockSpec((8, 128), lambda m: (0, m)),                # per-tile stats
        ],
        out_shape=[
            jax.ShapeDtypeStruct((Cout, M_pad), jnp.bfloat16),
            jax.ShapeDtypeStruct((8, G * 128), jnp.float32),
        ],
        scratch_shapes=[pltpu.VMEM((Cout, TM), jnp.float32)],
        compiler_params=cparams,
    )(w_taps, xslab, mask)

    # ---- tiny host combine: exact Chan parallel variance -> unbiased global std ----
    st = stats.reshape(8, G, 128)
    s1_g, m2_g, cnt_g = st[0, :, 0], st[1, :, 0], st[2, :, 0]
    n_total = jnp.sum(cnt_g)                                  # == Cout * N * H * W
    mean_total = jnp.sum(s1_g) / n_total
    tile_means = jnp.where(cnt_g > 0, s1_g / jnp.maximum(cnt_g, 1.0), 0.0)
    m2_total = jnp.sum(m2_g) + jnp.sum(cnt_g * (tile_means - mean_total) ** 2)
    var = m2_total / (n_total - 1.0)                          # torch.std: unbiased
    scale = jax.lax.rsqrt(var) * out_edge[0]

    # ---- epilogue: fold (out_edge / std) into the NCHW slice+transpose copy ----
    res_nchw = res_pad[:, :L].reshape(Cout, N, Hp, Wp)[:, :, :H, :W]
    out = res_nchw.astype(jnp.float32) * scale
    return jnp.transpose(out, (1, 0, 2, 3))                   # (N, Cout, H, W)


def reference_forward(x, conv_weight, out_edge, kernel_size, pad):
    """Pure-JAX f32 reference mirroring the PyTorch forward, for validation."""
    res = jax.lax.conv_general_dilated(
        x, jnp.abs(conv_weight), window_strides=(1, 1),
        padding=[(pad, pad), (pad, pad)],
        dimension_numbers=("NCHW", "OIHW", "NCHW"))
    std = jnp.sqrt(jnp.sum((res - jnp.mean(res)) ** 2) / (res.size - 1))
    return res / std * out_edge[0]


if __name__ == "__main__":
    # Module config (small, consistent with the PyTorch __init__ signature).
    spatial1 = spatial2 = 16
    in_channels = 4
    out_channels = 8
    desired_kernel = 3
    batch = 2

    kernel_size, pad = conv_identity_params(spatial1, desired_kernel)

    key = jax.random.PRNGKey(0)
    k_conv, k_edge, k_x = jax.random.split(key, 3)

    # Deterministic parameter init mirroring the PyTorch module:
    # xavier_normal_: std = gain * sqrt(2 / (fan_in + fan_out)), gain = 1.
    fan_in = in_channels * kernel_size * kernel_size
    fan_out = out_channels * kernel_size * kernel_size
    xavier_std = math.sqrt(2.0 / (fan_in + fan_out))
    conv_weight = xavier_std * jax.random.normal(
        k_conv, (out_channels, in_channels, kernel_size, kernel_size), jnp.float32)
    out_edge = 0.1 * jax.random.normal(k_edge, (1,), jnp.float32)

    # Input activations in [0, 1), as the module expects (NCHW).
    x = jax.random.uniform(k_x, (batch, in_channels, spatial1, spatial2), jnp.float32)

    ref = reference_forward(x, conv_weight, out_edge, kernel_size, pad)

    # Multi-tile path: exercises the M-grid, halo slabs, masking and the cross-tile
    # Chan std combine (G = ceil(2*18*18 / 128) = 6 tiles).
    out_tiled = weighted_convolution_forward(
        x, conv_weight, out_edge, kernel_size=kernel_size, pad=pad, tm=128)
    out_tiled = jax.block_until_ready(out_tiled)
    assert out_tiled.shape == (batch, out_channels, spatial1, spatial2)
    # bf16 input/weight/intermediate streams -> relaxed tolerance vs pure-f32 reference.
    assert jnp.allclose(out_tiled, ref, rtol=5e-2, atol=5e-3), "tiled mismatch vs. reference"

    # Auto tile-size path (single large tile at this problem size).
    out_auto = weighted_convolution_forward(
        x, conv_weight, out_edge, kernel_size=kernel_size, pad=pad, tm=None)
    out_auto = jax.block_until_ready(out_auto)
    assert out_auto.shape == (batch, out_channels, spatial1, spatial2)
    assert jnp.allclose(out_auto, ref, rtol=5e-2, atol=5e-3), "auto mismatch vs. reference"

    print("KERNEL_OK")
</pallas_src>

<mosaic_0001>
module attributes {stable_mosaic.version = 11 : i64} {
  func.func @_fused_conv_stats_kernel(%arg0: i32, %arg1: memref<9x8x4xbf16, #tpu.memory_space<vmem>>, %arg2: memref<1x4x256xbf16, #tpu.memory_space<vmem>>, %arg3: memref<1x128xbf16, #tpu.memory_space<vmem>>, %arg4: memref<8x128xbf16, #tpu.memory_space<vmem>>, %arg5: memref<8x128xf32, #tpu.memory_space<vmem>>, %arg6: memref<8x128xf32, #tpu.memory_space<vmem>>) attributes {dimension_semantics = [#tpu.dimension_semantics<parallel>], iteration_bounds = array<i64: 6>, scalar_prefetch = 0 : i64, scratch_operands = 1 : i64, tpu.core_type = #tpu.core_type<tc>, window_params = [{pipeline_mode = #tpu.pipeline_mode<synchronous>, transform_indices = @transform_0, window_bounds = array<i64: 9, 8, 4>}, {transform_indices = @transform_1, window_bounds = array<i64: 1, 4, 256>}, {transform_indices = @transform_2, window_bounds = array<i64: 1, 128>}, {transform_indices = @transform_3, window_bounds = array<i64: 8, 128>}, {transform_indices = @transform_4, window_bounds = array<i64: 8, 128>}]} {
    %c0 = arith.constant 0 : index
    %c0_0 = arith.constant 0 : index
    %c0_1 = arith.constant 0 : index
    %0 = vector.load %arg2[%c0, %c0_0, %c0_1] : memref<1x4x256xbf16, #tpu.memory_space<vmem>>, vector<1x4x128xbf16>
    %1 = vector.shape_cast %0 : vector<1x4x128xbf16> to vector<4x128xbf16>
    %c0_2 = arith.constant 0 : index
    %c0_3 = arith.constant 0 : index
    %c0_4 = arith.constant 0 : index
    %2 = vector.load %arg1[%c0_2, %c0_3, %c0_4] : memref<9x8x4xbf16, #tpu.memory_space<vmem>>, vector<1x8x4xbf16>
    %3 = vector.shape_cast %2 : vector<1x8x4xbf16> to vector<8x4xbf16>
    %cst = arith.constant dense<0.000000e+00> : vector<8x128xf32>
    %4 = tpu.matmul %3, %1, %cst {dimension_numbers = #tpu.dot_dimension_numbers<[1], [0], [0], [1], [0, 0, 1, 1], [], []>} : vector<8x4xbf16>, vector<4x128xbf16>, vector<8x128xf32> -> vector<8x128xf32>
    %c0_5 = arith.constant 0 : index
    %c0_6 = arith.constant 0 : index
    %5 = vector.load %arg6[%c0_5, %c0_6] : memref<8x128xf32, #tpu.memory_space<vmem>>, vector<8x128xf32>
    tpu.vector_store %arg6[%c0_5, %c0_6], %4 {strides = array<i32>} : memref<8x128xf32, #tpu.memory_space<vmem>>, vector<8x128xf32>,
    %c0_7 = arith.constant 0 : index
    %c0_8 = arith.constant 0 : index
    %c1 = arith.constant 1 : index
    %6 = vector.load %arg2[%c0_7, %c0_8, %c1] : memref<1x4x256xbf16, #tpu.memory_space<vmem>>, vector<1x4x128xbf16>
    %7 = vector.shape_cast %6 : vector<1x4x128xbf16> to vector<4x128xbf16>
    %c1_9 = arith.constant 1 : index
    %c0_10 = arith.constant 0 : index
    %c0_11 = arith.constant 0 : index
    %8 = vector.load %arg1[%c1_9, %c0_10, %c0_11] : memref<9x8x4xbf16, #tpu.memory_space<vmem>>, vector<1x8x4xbf16>
    %9 = vector.shape_cast %8 : vector<1x8x4xbf16> to vector<8x4xbf16>
    %cst_12 = arith.constant dense<0.000000e+00> : vector<8x128xf32>
    %10 = tpu.matmul %9, %7, %cst_12 {dimension_numbers = #tpu.dot_dimension_numbers<[1], [0], [0], [1], [0, 0, 1, 1], [], []>} : vector<8x4xbf16>, vector<4x128xbf16>, vector<8x128xf32> -> vector<8x128xf32>
    %c0_13 = arith.constant 0 : index
    %c0_14 = arith.constant 0 : index
    %11 = vector.load %arg6[%c0_13, %c0_14] : memref<8x128xf32, #tpu.memory_space<vmem>>, vector<8x128xf32>
    %12 = arith.addf %11, %10 : vector<8x128xf32>
    %c0_15 = arith.constant 0 : index
    %c0_16 = arith.constant 0 : index
    %13 = vector.load %arg6[%c0_15, %c0_16] : memref<8x128xf32, #tpu.memory_space<vmem>>, vector<8x128xf32>
    tpu.vector_store %arg6[%c0_15, %c0_16], %12 {strides = array<i32>} : memref<8x128xf32, #tpu.memory_space<vmem>>, vector<8x128xf32>,
    %c0_17 = arith.constant 0 : index
    %c0_18 = arith.constant 0 : index
    %c2 = arith.constant 2 : index
    %14 = vector.load %arg2[%c0_17, %c0_18, %c2] : memref<1x4x256xbf16, #tpu.memory_space<vmem>>, vector<1x4x128xbf16>
    %15 = vector.shape_cast %14 : vector<1x4x128xbf16> to vector<4x128xbf16>
    %c2_19 = arith.constant 2 : index
    %c0_20 = arith.constant 0 : index
    %c0_21 = arith.constant 0 : index
    %16 = vector.load %arg1[%c2_19, %c0_20, %c0_21] : memref<9x8x4xbf16, #tpu.memory_space<vmem>>, vector<1x8x4xbf16>
    %17 = vector.shape_cast %16 : vector<1x8x4xbf16> to vector<8x4xbf16>
    %cst_22 = arith.constant dense<0.000000e+00> : vector<8x128xf32>
    %18 = tpu.matmul %17, %15, %cst_22 {dimension_numbers = #tpu.dot_dimension_numbers<[1], [0], [0], [1], [0, 0, 1, 1], [], []>} : vector<8x4xbf16>, vector<4x128xbf16>, vector<8x128xf32> -> vector<8x128xf32>
    %c0_23 = arith.constant 0 : index
    %c0_24 = arith.constant 0 : index
    %19 = vector.load %arg6[%c0_23, %c0_24] : memref<8x128xf32, #tpu.memory_space<vmem>>, vector<8x128xf32>
    %20 = arith.addf %19, %18 : vector<8x128xf32>
    %c0_25 = arith.constant 0 : index
    %c0_26 = arith.constant 0 : index
    %21 = vector.load %arg6[%c0_25, %c0_26] : memref<8x128xf32, #tpu.memory_space<vmem>>, vector<8x128xf32>
    tpu.vector_store %arg6[%c0_25, %c0_26], %20 {strides = array<i32>} : memref<8x128xf32, #tpu.memory_space<vmem>>, vector<8x128xf32>,
    %c0_27 = arith.constant 0 : index
    %c0_28 = arith.constant 0 : index
    %c18 = arith.constant 18 : index
    %22 = vector.load %arg2[%c0_27, %c0_28, %c18] : memref<1x4x256xbf16, #tpu.memory_space<vmem>>, vector<1x4x128xbf16>
    %23 = vector.shape_cast %22 : vector<1x4x128xbf16> to vector<4x128xbf16>
    %c3 = arith.constant 3 : index
    %c0_29 = arith.constant 0 : index
    %c0_30 = arith.constant 0 : index
    %24 = vector.load %arg1[%c3, %c0_29, %c0_30] : memref<9x8x4xbf16, #tpu.memory_space<vmem>>, vector<1x8x4xbf16>
    %25 = vector.shape_cast %24 : vector<1x8x4xbf16> to vector<8x4xbf16>
    %cst_31 = arith.constant dense<0.000000e+00> : vector<8x128xf32>
    %26 = tpu.matmul %25, %23, %cst_31 {dimension_numbers = #tpu.dot_dimension_numbers<[1], [0], [0], [1], [0, 0, 1, 1], [], []>} : vector<8x4xbf16>, vector<4x128xbf16>, vector<8x128xf32> -> vector<8x128xf32>
    %c0_32 = arith.constant 0 : index
    %c0_33 = arith.constant 0 : index
    %27 = vector.load %arg6[%c0_32, %c0_33] : memref<8x128xf32, #tpu.memory_space<vmem>>, vector<8x128xf32>
    %28 = arith.addf %27, %26 : vector<8x128xf32>
    %c0_34 = arith.constant 0 : index
    %c0_35 = arith.constant 0 : index
    %29 = vector.load %arg6[%c0_34, %c0_35] : memref<8x128xf32, #tpu.memory_space<vmem>>, vector<8x128xf32>
    tpu.vector_store %arg6[%c0_34, %c0_35], %28 {strides = array<i32>} : memref<8x128xf32, #tpu.memory_space<vmem>>, vector<8x128xf32>,
    %c0_36 = arith.constant 0 : index
    %c0_37 = arith.constant 0 : index
    %c19 = arith.constant 19 : index
    %30 = vector.load %arg2[%c0_36, %c0_37, %c19] : memref<1x4x256xbf16, #tpu.memory_space<vmem>>, vector<1x4x128xbf16>
    %31 = vector.shape_cast %30 : vector<1x4x128xbf16> to vector<4x128xbf16>
    %c4 = arith.constant 4 : index
    %c0_38 = arith.constant 0 : index
    %c0_39 = arith.constant 0 : index
    %32 = vector.load %arg1[%c4, %c0_38, %c0_39] : memref<9x8x4xbf16, #tpu.memory_space<vmem>>, vector<1x8x4xbf16>
    %33 = vector.shape_cast %32 : vector<1x8x4xbf16> to vector<8x4xbf16>
    %cst_40 = arith.constant dense<0.000000e+00> : vector<8x128xf32>
    %34 = tpu.matmul %33, %31, %cst_40 {dimension_numbers = #tpu.dot_dimension_numbers<[1], [0], [0], [1], [0, 0, 1, 1], [], []>} : vector<8x4xbf16>, vector<4x128xbf16>, vector<8x128xf32> -> vector<8x128xf32>
    %c0_41 = arith.constant 0 : index
    %c0_42 = arith.constant 0 : index
    %35 = vector.load %arg6[%c0_41, %c0_42] : memref<8x128xf32, #tpu.memory_space<vmem>>, vector<8x128xf32>
    %36 = arith.addf %35, %34 : vector<8x128xf32>
    %c0_43 = arith.constant 0 : index
    %c0_44 = arith.constant 0 : index
    %37 = vector.load %arg6[%c0_43, %c0_44] : memref<8x128xf32, #tpu.memory_space<vmem>>, vector<8x128xf32>
    tpu.vector_store %arg6[%c0_43, %c0_44], %36 {strides = array<i32>} : memref<8x128xf32, #tpu.memory_space<vmem>>, vector<8x128xf32>,
    %c0_45 = arith.constant 0 : index
    %c0_46 = arith.constant 0 : index
    %c20 = arith.constant 20 : index
    %38 = vector.load %arg2[%c0_45, %c0_46, %c20] : memref<1x4x256xbf16, #tpu.memory_space<vmem>>, vector<1x4x128xbf16>
    %39 = vector.shape_cast %38 : vector<1x4x128xbf16> to vector<4x128xbf16>
    %c5 = arith.constant 5 : index
    %c0_47 = arith.constant 0 : index
    %c0_48 = arith.constant 0 : index
    %40 = vector.load %arg1[%c5, %c0_47, %c0_48] : memref<9x8x4xbf16, #tpu.memory_space<vmem>>, vector<1x8x4xbf16>
    %41 = vector.shape_cast %40 : vector<1x8x4xbf16> to vector<8x4xbf16>
    %cst_49 = arith.constant dense<0.000000e+00> : vector<8x128xf32>
    %42 = tpu.matmul %41, %39, %cst_49 {dimension_numbers = #tpu.dot_dimension_numbers<[1], [0], [0], [1], [0, 0, 1, 1], [], []>} : vector<8x4xbf16>, vector<4x128xbf16>, vector<8x128xf32> -> vector<8x128xf32>
    %c0_50 = arith.constant 0 : index
    %c0_51 = arith.constant 0 : index
    %43 = vector.load %arg6[%c0_50, %c0_51] : memref<8x128xf32, #tpu.memory_space<vmem>>, vector<8x128xf32>
    %44 = arith.addf %43, %42 : vector<8x128xf32>
    %c0_52 = arith.constant 0 : index
    %c0_53 = arith.constant 0 : index
    %45 = vector.load %arg6[%c0_52, %c0_53] : memref<8x128xf32, #tpu.memory_space<vmem>>, vector<8x128xf32>
    tpu.vector_store %arg6[%c0_52, %c0_53], %44 {strides = array<i32>} : memref<8x128xf32, #tpu.memory_space<vmem>>, vector<8x128xf32>,
    %c0_54 = arith.constant 0 : index
    %c0_55 = arith.constant 0 : index
    %c36 = arith.constant 36 : index
    %46 = vector.load %arg2[%c0_54, %c0_55, %c36] : memref<1x4x256xbf16, #tpu.memory_space<vmem>>, vector<1x4x128xbf16>
    %47 = vector.shape_cast %46 : vector<1x4x128xbf16> to vector<4x128xbf16>
    %c6 = arith.constant 6 : index
    %c0_56 = arith.constant 0 : index
    %c0_57 = arith.constant 0 : index
    %48 = vector.load %arg1[%c6, %c0_56, %c0_57] : memref<9x8x4xbf16, #tpu.memory_space<vmem>>, vector<1x8x4xbf16>
    %49 = vector.shape_cast %48 : vector<1x8x4xbf16> to vector<8x4xbf16>
    %cst_58 = arith.constant dense<0.000000e+00> : vector<8x128xf32>
    %50 = tpu.matmul %49, %47, %cst_58 {dimension_numbers = #tpu.dot_dimension_numbers<[1], [0], [0], [1], [0, 0, 1, 1], [], []>} : vector<8x4xbf16>, vector<4x128xbf16>, vector<8x128xf32> -> vector<8x128xf32>
    %c0_59 = arith.constant 0 : index
    %c0_60 = arith.constant 0 : index
    %51 = vector.load %arg6[%c0_59, %c0_60] : memref<8x128xf32, #tpu.memory_space<vmem>>, vector<8x128xf32>
    %52 = arith.addf %51, %50 : vector<8x128xf32>
    %c0_61 = arith.constant 0 : index
    %c0_62 = arith.constant 0 : index
    %53 = vector.load %arg6[%c0_61, %c0_62] : memref<8x128xf32, #tpu.memory_space<vmem>>, vector<8x128xf32>
    tpu.vector_store %arg6[%c0_61, %c0_62], %52 {strides = array<i32>} : memref<8x128xf32, #tpu.memory_space<vmem>>, vector<8x128xf32>,
    %c0_63 = arith.constant 0 : index
    %c0_64 = arith.constant 0 : index
    %c37 = arith.constant 37 : index
    %54 = vector.load %arg2[%c0_63, %c0_64, %c37] : memref<1x4x256xbf16, #tpu.memory_space<vmem>>, vector<1x4x128xbf16>
    %55 = vector.shape_cast %54 : vector<1x4x128xbf16> to vector<4x128xbf16>
    %c7 = arith.constant 7 : index
    %c0_65 = arith.constant 0 : index
    %c0_66 = arith.constant 0 : index
    %56 = vector.load %arg1[%c7, %c0_65, %c0_66] : memref<9x8x4xbf16, #tpu.memory_space<vmem>>, vector<1x8x4xbf16>
    %57 = vector.shape_cast %56 : vector<1x8x4xbf16> to vector<8x4xbf16>
    %cst_67 = arith.constant dense<0.000000e+00> : vector<8x128xf32>
    %58 = tpu.matmul %57, %55, %cst_67 {dimension_numbers = #tpu.dot_dimension_numbers<[1], [0], [0], [1], [0, 0, 1, 1], [], []>} : vector<8x4xbf16>, vector<4x128xbf16>, vector<8x128xf32> -> vector<8x128xf32>
    %c0_68 = arith.constant 0 : index
    %c0_69 = arith.constant 0 : index
    %59 = vector.load %arg6[%c0_68, %c0_69] : memref<8x128xf32, #tpu.memory_space<vmem>>, vector<8x128xf32>
    %60 = arith.addf %59, %58 : vector<8x128xf32>
    %c0_70 = arith.constant 0 : index
    %c0_71 = arith.constant 0 : index
    %61 = vector.load %arg6[%c0_70, %c0_71] : memref<8x128xf32, #tpu.memory_space<vmem>>, vector<8x128xf32>
    tpu.vector_store %arg6[%c0_70, %c0_71], %60 {strides = array<i32>} : memref<8x128xf32, #tpu.memory_space<vmem>>, vector<8x128xf32>,
    %c0_72 = arith.constant 0 : index
    %c0_73 = arith.constant 0 : index
    %c38 = arith.constant 38 : index
    %62 = vector.load %arg2[%c0_72, %c0_73, %c38] : memref<1x4x256xbf16, #tpu.memory_space<vmem>>, vector<1x4x128xbf16>
    %63 = vector.shape_cast %62 : vector<1x4x128xbf16> to vector<4x128xbf16>
    %c8 = arith.constant 8 : index
    %c0_74 = arith.constant 0 : index
    %c0_75 = arith.constant 0 : index
    %64 = vector.load %arg1[%c8, %c0_74, %c0_75] : memref<9x8x4xbf16, #tpu.memory_space<vmem>>, vector<1x8x4xbf16>
    %65 = vector.shape_cast %64 : vector<1x8x4xbf16> to vector<8x4xbf16>
    %cst_76 = arith.constant dense<0.000000e+00> : vector<8x128xf32>
    %66 = tpu.matmul %65, %63, %cst_76 {dimension_numbers = #tpu.dot_dimension_numbers<[1], [0], [0], [1], [0, 0, 1, 1], [], []>} : vector<8x4xbf16>, vector<4x128xbf16>, vector<8x128xf32> -> vector<8x128xf32>
    %c0_77 = arith.constant 0 : index
    %c0_78 = arith.constant 0 : index
    %67 = vector.load %arg6[%c0_77, %c0_78] : memref<8x128xf32, #tpu.memory_space<vmem>>, vector<8x128xf32>
    %68 = arith.addf %67, %66 : vector<8x128xf32>
    %c0_79 = arith.constant 0 : index
    %c0_80 = arith.constant 0 : index
    %69 = vector.load %arg6[%c0_79, %c0_80] : memref<8x128xf32, #tpu.memory_space<vmem>>, vector<8x128xf32>
    tpu.vector_store %arg6[%c0_79, %c0_80], %68 {strides = array<i32>} : memref<8x128xf32, #tpu.memory_space<vmem>>, vector<8x128xf32>,
    %c0_81 = arith.constant 0 : index
    %c0_82 = arith.constant 0 : index
    %70 = vector.load %arg6[%c0_81, %c0_82] : memref<8x128xf32, #tpu.memory_space<vmem>>, vector<8x128xf32>
    %71 = arith.truncf %70 : vector<8x128xf32> to vector<8x128xbf16>
    %c0_83 = arith.constant 0 : index
    %c0_84 = arith.constant 0 : index
    %72 = vector.load %arg4[%c0_83, %c0_84] : memref<8x128xbf16, #tpu.memory_space<vmem>>, vector<8x128xbf16>
    tpu.vector_store %arg4[%c0_83, %c0_84], %71 {strides = array<i32>} : memref<8x128xbf16, #tpu.memory_space<vmem>>, vector<8x128xbf16>,
    %c0_85 = arith.constant 0 : index
    %c0_86 = arith.constant 0 : index
    %73 = vector.load %arg3[%c0_85, %c0_86] : memref<1x128xbf16, #tpu.memory_space<vmem>>, vector<1x128xbf16>
    %74 = arith.extf %73 : vector<1x128xbf16> to vector<1x128xf32>
    %75 = vector.shape_cast %74 : vector<1x128xf32> to vector<1x1x128xf32>
    %cst_87 = arith.constant dense<0.000000e+00> : vector<1xf32>
    %76 = vector.multi_reduction <add>, %75, %cst_87 [1, 2] : vector<1x1x128xf32> to vector<1xf32>
    %77 = vector.shape_cast %76 : vector<1xf32> to vector<1x1x1xf32>
    %78 = vector.extract %77[0, 0, 0] : f32 from vector<1x1x1xf32>
    %cst_88 = arith.constant 8.000000e+00 : f32
    %79 = arith.mulf %78, %cst_88 : f32
    %80 = vector.broadcast %74 : vector<1x128xf32> to vector<8x128xf32>
    %81 = arith.mulf %70, %80 : vector<8x128xf32>
    %82 = vector.shape_cast %81 : vector<8x128xf32> to vector<1x8x128xf32>
    %cst_89 = arith.constant dense<0.000000e+00> : vector<1xf32>
    %83 = vector.multi_reduction <add>, %82, %cst_89 [1, 2] : vector<1x8x128xf32> to vector<1xf32>
    %84 = vector.shape_cast %83 : vector<1xf32> to vector<1x1x1xf32>
    %85 = vector.extract %84[0, 0, 0] : f32 from vector<1x1x1xf32>
    %cst_90 = arith.constant 1.000000e+00 : f32
    %86 = arith.maximumf %79, %cst_90 : f32
    %87 = arith.divf %85, %86 : f32
    %88 = vector.broadcast %87 : f32 to vector<8x128xf32>
    %89 = arith.subf %70, %88 : vector<8x128xf32>
    %90 = vector.broadcast %74 : vector<1x128xf32> to vector<8x128xf32>
    %91 = arith.mulf %89, %90 : vector<8x128xf32>
    %92 = arith.mulf %91, %91 : vector<8x128xf32>
    %93 = vector.shape_cast %92 : vector<8x128xf32> to vector<1x8x128xf32>
    %cst_91 = arith.constant dense<0.000000e+00> : vector<1xf32>
    %94 = vector.multi_reduction <add>, %93, %cst_91 [1, 2] : vector<1x8x128xf32> to vector<1xf32>
    %95 = vector.shape_cast %94 : vector<1xf32> to vector<1x1x1xf32>
    %96 = vector.extract %95[0, 0, 0] : f32 from vector<1x1x1xf32>
    %97 = tpu.iota {dimensions = array<i32: 0>} : vector<8x128xi32>
    %c0_i32 = arith.constant 0 : i32
    %98 = vector.broadcast %c0_i32 : i32 to vector<8x128xi32>
    %99 = arith.cmpi eq, %97, %98 : vector<8x128xi32>
    %c1_i32 = arith.constant 1 : i32
    %100 = vector.broadcast %c1_i32 : i32 to vector<8x128xi32>
    %101 = arith.cmpi eq, %97, %100 : vector<8x128xi32>
    %c2_i32 = arith.constant 2 : i32
    %102 = vector.broadcast %c2_i32 : i32 to vector<8x128xi32>
    %103 = arith.cmpi eq, %97, %102 : vector<8x128xi32>
    %cst_92 = arith.constant 0.000000e+00 : f32
    %104 = vector.broadcast %79 : f32 to vector<8x128xf32>
    %105 = vector.broadcast %cst_92 : f32 to vector<8x128xf32>
    %106 = arith.select %103, %104, %105 : vector<8x128xi1>, vector<8x128xf32>
    %107 = vector.broadcast %96 : f32 to vector<8x128xf32>
    %108 = arith.select %101, %107, %106 : vector<8x128xi1>, vector<8x128xf32>
    %109 = vector.broadcast %85 : f32 to vector<8x128xf32>
    %110 = arith.select %99, %109, %108 : vector<8x128xi1>, vector<8x128xf32>
    %c0_93 = arith.constant 0 : index
    %c0_94 = arith.constant 0 : index
    %111 = vector.load %arg5[%c0_93, %c0_94] : memref<8x128xf32, #tpu.memory_space<vmem>>, vector<8x128xf32>
    tpu.vector_store %arg5[%c0_93, %c0_94], %110 {strides = array<i32>} : memref<8x128xf32, #tpu.memory_space<vmem>>, vector<8x128xf32>,
    return
  }
  func.func @transform_0(%arg0: i32) -> (i32, i32, i32) {
    %c0_i32 = arith.constant 0 : i32
    %c0_i32_0 = arith.constant 0 : i32
    %c0_i32_1 = arith.constant 0 : i32
    %c0_i32_2 = arith.constant 0 : i32
    return %c0_i32, %c0_i32_0, %c0_i32_1 : i32, i32, i32
  }
  func.func @transform_1(%arg0: i32) -> (i32, i32, i32) {
    %c0_i32 = arith.constant 0 : i32
    %c0_i32_0 = arith.constant 0 : i32
    %c0_i32_1 = arith.constant 0 : i32
    return %arg0, %c0_i32, %c0_i32_0 : i32, i32, i32
  }
  func.func @transform_2(%arg0: i32) -> (i32, i32) {
    %c0_i32 = arith.constant 0 : i32
    %c0_i32_0 = arith.constant 0 : i32
    return %c0_i32, %arg0 : i32, i32
  }
  func.func @transform_3(%arg0: i32) -> (i32, i32) {
    %c0_i32 = arith.constant 0 : i32
    %c0_i32_0 = arith.constant 0 : i32
    return %c0_i32, %arg0 : i32, i32
  }
  func.func @transform_4(%arg0: i32) -> (i32, i32) {
    %c0_i32 = arith.constant 0 : i32
    %c0_i32_0 = arith.constant 0 : i32
    return %c0_i32, %arg0 : i32, i32
  }
}

</mosaic_0001>

<bundles_post_ra>
// kernel: tile.5
= control target key start
LH: loop header
LB: loop body
LE: loop exit
PB: predicated region body
PF: predicated region fallthrough
CT: control target
= control target key end

     0   :  { %vm54_vm0 = vcmask 15360   ;;  %s207_s10 = smov 126   ;;  %vm67_vm1 = vcmask 31744   ;;  %s208_s11 = smov 90   ;;  %vm48_vm2 = vcmask 146432   ;;  %vm58_vm3 = vcmask 130048   ;;  %s242_s0 = inlined_call_operand.vmem [shape: bf16[18,18], index: 0, kind: input, shape index: {}]   ;;  %s243_s1 = inlined_call_operand.vmem [shape: bf16[324], index: 1, kind: output, shape index: {}]  }
   0x1   :  { %v186_v0 = vld [vmem:[%s242_s0] sm:$0xff]   ;;  %v183_v3 = vld [vmem:[%s242_s0 + $0x8] sm:$0xf]  ;;  %s206_s0 = smov 108   ;;  %s209_s12 = smov 106   ;;  %vm61_vm4 = vcmask 1048560  }
   0x2   :  { %v187_v1 = vunpack.c.l.bf16 %v186_v0  ;;  %v188_v2 = vunpack.c.h.bf16 %v186_v0  ;;  %v15_v4 = vunpack.c.l.bf16 %v183_v3  ;;  %s210_s13 = smov 124   ;;  %s211_s14 = smov 88   ;;  %vm81_vm5 = vcmask 1032032  }
   0x3   :  { %s212_s15 = smov 70   ;;  %s213_s16 = smov 72   ;;  %vm94_vm6 = vcmask 884432   ;;  %vm71_vm7 = vcmask 113664   ;;  %vm74_vm8 = vcmask 1048544   ;;  %vm87_vm9 = vcmask 1015632  }
   0x4   :  { %46 = vst [vmem:[#allocation1] sm:$0xff] %v187_v1  ;;  %s214_s17 = smov 54   ;;  %s215_s18 = smov 50   ;;  %vm100_vm10 = vcmask 868032   ;;  %vm113_vm11 = vcmask 720432   ;;  %vm107_vm12 = vcmask 736832  }
   0x5   :  { %33 = vst [vmem:[#allocation1 + $0x8] sm:$0xff] %v188_v2  ;;  %s216_s19 = smov 52   ;;  %s217_s20 = smov 36   ;;  %vm120_vm13 = vcmask 589232   ;;  %vm140_vm14 = vcmask 441632   ;;  %vm160_vm15 = vcmask 294032  }
   0x6   :  { %18 = vst [vmem:[#allocation1 + $0x10] sm:$0xff] %v15_v4  ;;  %s218_s21 = smov 32   ;;  %s219_s22 = smov 34  }
   0x7   :  { %s220_s23 = smov 18   ;;  %s221_s24 = smov 14  }
   0x8   :  { %s222_s25 = smov 16  }
   0xb   :  { %v78_v5 = vld [vmem:[#allocation1 + $0x6] sm:$0x1]   ;;  %v51_v6 = vld [vmem:[#allocation1 + $0x7] sm:$0x1]   ;;  %v91_v9 = vld [vmem:[#allocation1 + $0x5] sm:$0x1]  }
   0xc   :  { %v53_v7 = vld [vmem:[#allocation1 + $0x7] sm:$0x1]   ;;  %79 = vrot.lane.b32.xlu1 %v78_v5, %s206_s0  ;;  %v64_v10 = vld [vmem:[#allocation1 + $0xe] sm:$0x1]   ;;  %92 = vrot.lane.b32.xlu2 %v91_v9, %s208_s11  ;;  %v84_v12 = vld [vmem:[#allocation1 + $0xd] sm:$0x1]  }
   0xd   :  { %v55_v8 = vsel %vm54_vm0, %v53_v7, %v51_v6  ;;  %v66_v11 = vld [vmem:[#allocation1 + $0xe] sm:$0x1]   ;;  %v97_v14 = vld [vmem:[#allocation1 + $0xc] sm:$0x1]   ;;  %v110_v15 = vld [vmem:[#allocation1 + $0xb] sm:$0x1]  }
   0xe   :  { %56 = vrot.lane.b32.xlu0 %v55_v8, %s207_s10  ;;  %v68_v13 = vsel %vm67_vm1, %v66_v11, %v64_v10  ;;  %v104_v16 = vld [vmem:[#allocation1 + $0x4] sm:$0x1]   ;;  %v117_v17 = vld [vmem:[#allocation1 + $0x3] sm:$0x1]   ;;  %v130_v18 = vld [vmem:[#allocation1 + $0x11] sm:$0x1]  }
   0xf   :  { %v123_v19 = vld [vmem:[#allocation1 + $0xa] sm:$0x1]   ;;  %v137_v20 = vld [vmem:[#allocation1 + $0x2] sm:$0x1]   ;;  %v150_v21 = vld [vmem:[#allocation1 + $0x10] sm:$0x1]  }
  0x10   :  { %v143_v22 = vld [vmem:[#allocation1 + $0x9] sm:$0x1]   ;;  %v157_v23 = vld [vmem:[#allocation1 + $0x1] sm:$0x1]   ;;  %v170_v24 = vld [vmem:[#allocation1 + $0xf] sm:$0x1]  }
  0x11   :  { %v163_v25 = vld [vmem:[#allocation1 + $0x8] sm:$0x1]   ;;  %v47_v26 = vld [vmem:[#allocation1] sm:$0x1]   ;;  %vm133_vm0 = vcmask 556432   ;;  %vm126_vm1 = vcmask 572832  }
  0x12   :  { %49 = vst.msk [vmem:[#allocation0] sm:$0x1] %vm48_vm2, %v47_v26   ;;  %vm153_vm2 = vcmask 408832  }
  0x14   :  { %85 = vrot.lane.b32.xlu1 %v84_v12, %s209_s12  ;;  %98 = vrot.lane.b32.xlu2 %v97_v14, %s211_s14 }
  0x16   :  { %69 = vrot.lane.b32.xlu0 %v68_v13, %s210_s13 }
  0x1c   :  { %111 = vrot.lane.b32.xlu1 %v110_v15, %s212_s15  ;;  %118 = vrot.lane.b32.xlu2 %v117_v17, %s214_s17 }
  0x1e   :  { %105 = vrot.lane.b32.xlu0 %v104_v16, %s213_s16 }
  0x24   :  { %131 = vrot.lane.b32.xlu1 %v130_v18, %s215_s18  ;;  %138 = vrot.lane.b32.xlu2 %v137_v20, %s217_s20 }
  0x26   :  { %124 = vrot.lane.b32.xlu0 %v123_v19, %s216_s19 }
  0x2c   :  { %151 = vrot.lane.b32.xlu1 %v150_v21, %s218_s21  ;;  %158 = vrot.lane.b32.xlu2 %v157_v23, %s220_s23 }
  0x2e   :  { %144 = vrot.lane.b32.xlu0 %v143_v22, %s219_s22 }
  0x34   :  { %171 = vrot.lane.b32.xlu1 %v170_v24, %s221_s24 }
  0x36   :  { %164 = vrot.lane.b32.xlu0 %v163_v25, %s222_s25 }
  0x66   :  { %v93_v27 = vpop.permute.xlu2 %92  }
  0x6e   :  { %v99_v28 = vpop.permute.xlu2 %98  }
  0x76   :  { %v119_v29 = vpop.permute.xlu2 %118  }
  0x7e   :  { %v80_v30 = vpop.permute.xlu1 %79   ;;  %v139_v32 = vpop.permute.xlu2 %138  }
  0x80   :  { %v57_v31 = vpop.permute.xlu0 %56  }
  0x81   :  { %60 = vst.msk [vmem:[#allocation0 + $0x1] sm:$0x1] %vm58_vm3, %v57_v31   ;;  %vm146_vm3 = vcmask 425232  }
  0x82   :  { %62 = vst.msk [vmem:[#allocation0] sm:$0x1] %vm61_vm4, %v57_v31   ;;  %vm173_vm4 = vcmask 261232  }
  0x83   :  { %82 = vst.msk [vmem:[#allocation0] sm:$0x1] %vm81_vm5, %v80_v30   ;;  %vm166_vm5 = vcmask 277632  }
  0x84   :  { %95 = vst.msk [vmem:[#allocation0] sm:$0x1] %vm94_vm6, %v93_v27  }
  0x86   :  { %v86_v33 = vpop.permute.xlu1 %85   ;;  %v159_v35 = vpop.permute.xlu2 %158  }
  0x88   :  { %v70_v34 = vpop.permute.xlu0 %69  }
  0x89   :  { %73 = vst.msk [vmem:[#allocation0 + $0x2] sm:$0x1] %vm71_vm7, %v70_v34  }
  0x8a   :  { %76 = vst.msk [vmem:[#allocation0 + $0x1] sm:$0x1] %vm74_vm8, %v70_v34  }
  0x8b   :  { %89 = vst.msk [vmem:[#allocation0 + $0x1] sm:$0x1] %vm87_vm9, %v86_v33  }
  0x8c   :  { %102 = vst.msk [vmem:[#allocation0 + $0x1] sm:$0x1] %vm100_vm10, %v99_v28  }
  0x8e   :  { %v112_v36 = vpop.permute.xlu1 %111  }
  0x8f   :  { %115 = vst.msk [vmem:[#allocation0 + $0x1] sm:$0x1] %vm113_vm11, %v112_v36  }
  0x90   :  { %v106_v37 = vpop.permute.xlu0 %105  }
  0x91   :  { %108 = vst.msk [vmem:[#allocation0] sm:$0x1] %vm107_vm12, %v106_v37  }
  0x92   :  { %121 = vst.msk [vmem:[#allocation0] sm:$0x1] %vm120_vm13, %v119_v29  }
  0x93   :  { %141 = vst.msk [vmem:[#allocation0] sm:$0x1] %vm140_vm14, %v139_v32  }
  0x94   :  { %161 = vst.msk [vmem:[#allocation0] sm:$0x1] %vm160_vm15, %v159_v35  }
  0x96   :  { %v132_v38 = vpop.permute.xlu1 %131  }
  0x97   :  { %135 = vst.msk [vmem:[#allocation0 + $0x2] sm:$0x1] %vm133_vm0, %v132_v38  }
  0x98   :  { %v125_v39 = vpop.permute.xlu0 %124  }
  0x99   :  { %128 = vst.msk [vmem:[#allocation0 + $0x1] sm:$0x1] %vm126_vm1, %v125_v39  }
  0x9e   :  { %v152_v40 = vpop.permute.xlu1 %151  }
  0x9f   :  { %155 = vst.msk [vmem:[#allocation0 + $0x2] sm:$0x1] %vm153_vm2, %v152_v40  }
  0xa0   :  { %v145_v41 = vpop.permute.xlu0 %144  }
  0xa1   :  { %148 = vst.msk [vmem:[#allocation0 + $0x1] sm:$0x1] %vm146_vm3, %v145_v41  }
  0xa6   :  { %v172_v42 = vpop.permute.xlu1 %171  }
  0xa7   :  { %175 = vst.msk [vmem:[#allocation0 + $0x2] sm:$0x1] %vm173_vm4, %v172_v42  }
  0xa8   :  { %v165_v43 = vpop.permute.xlu0 %164  }
  0xa9   :  { %168 = vst.msk [vmem:[#allocation0 + $0x1] sm:$0x1] %vm166_vm5, %v165_v43  }
  0xb0   :  { %v178_v44 = vld [vmem:[#allocation0] sm:$0xf] }
  0xb1   :  { %v179_v45 = vpack.c.bf16 0.0, %v178_v44 }
  0xb3   :  { %182 = vst [vmem:[%s243_s1] sm:$0x3] %v179_v45 }

// kernel: tile.7
= control target key start
LH: loop header
LB: loop body
LE: loop exit
PB: predicated region body
PF: predicated region fallthrough
CT: control target
= control target key end

     0   :  { %vm59_vm0 = vcmask 490496   ;;  %s87_s12 = smov 68   ;;  %s70_s13 = smov 3  ;;  %vm49_vm1 = vcmask 556032   ;;  %vm63_vm2 = vcmask 64512   ;;  %vm66_vm3 = vcmask 1048096   ;;  %s110_s0 = inlined_call_operand.vmem [shape: bf16[2,324], index: 0, kind: input, shape index: {}]   ;;  %s111_s1 = inlined_call_operand.vmem [shape: bf16[648], index: 1, kind: output, shape index: {}]  }
   0x1   :  { %v84_v0 = vld [vmem:[%s110_s0 + $0x2] sm:$0x1]  ;;  %v85_v1 = vld [vmem:[%s110_s0 + $0x1] sm:$0x1]  ;;  %v43_v2 = vld [vmem:[%s110_s0] sm:$0x1] }
   0x2   :  { %v15_v3 = vunpack.c.l.bf16 %v84_v0  ;;  %v30_v4 = vunpack.c.l.bf16 %v85_v1  ;;  %v44_v5 = vunpack.c.l.bf16 %v43_v2  ;;  %s52_s0 = smov 3 }
   0x4   :  { %18 = vst [vmem:[#allocation1 + $0x10] sm:$0x3] %v15_v3 }
   0x5   :  { %33 = vst [vmem:[#allocation1 + $0x8] sm:$0x3] %v30_v4 }
   0x6   :  { %46 = vst [vmem:[#allocation1] sm:$0x3] %v44_v5 }
   0xb   :  { %v56_v6 = vld [vmem:[#allocation1 + $0x11] sm:$0x1]   ;;  %v48_v11 = vld [vmem:[#allocation1 + $0x10] sm:$0x1]  }
   0xc   :  { %51 = vst.msk [vmem:[#allocation0 + $0x2] sm:$0x1] %vm49_vm1, %v48_v11  }
   0xd   :  { %v58_v7 = vld [vmem:[#allocation1 + $0x1] ss:$8 sm:$0x7]   ;;  %v53_v9 = vld [vmem:[#allocation1] ss:$8 sm:%s52_s0]  }
   0xe   :  { %v60_v8 = vsel %vm59_vm0, %v58_v7, %v56_v6  ;;  %54 = vst [vmem:[#allocation0] sm:$0x3] %v53_v9   ;;  %v71_v10 = vld [vmem:[#allocation1 + $0x1] ss:$8 sm:%s70_s13]  }
   0xf   :  { %61 = vrot.lane.b32.xlu0 %v60_v8, %s87_s12 }
  0x17   :  { %72 = vrot.lane.b32.xlu0 %v71_v10, %s87_s12 }
  0x81   :  { %v62_v12 = vpop.permute.xlu0 %61  }
  0x82   :  { %65 = vst.msk [vmem:[#allocation0 + $0x5] sm:$0x1] %vm63_vm2, %v62_v12  }
  0x83   :  { %68 = vst.msk [vmem:[#allocation0 + $0x2] sm:$0x7] %vm66_vm3, %v62_v12  }
  0x89   :  { %v73_v13 = vpop.permute.xlu0 %72  }
  0x8a   :  { %76 = vst.msk [vmem:[#allocation0 + $0x3] sm:$0x3] %vm49_vm1, %v73_v13  }
  0x91   :  { %v79_v14 = vld [vmem:[#allocation0] sm:$0xff] }
  0x92   :  { %v80_v15 = vpack.c.bf16 0.0, %v79_v14 }
  0x94   :  { %83 = vst [vmem:[%s111_s1] sm:$0xf] %v80_v15 }

// kernel: tile.6
= control target key start
LH: loop header
LB: loop body
LE: loop exit
PB: predicated region body
PF: predicated region fallthrough
CT: control target
= control target key end

     0   :  { %s56_s0 = inlined_call_operand.vmem [shape: bf16[324], index: 0, kind: input, shape index: {}]   ;;  %s57_s1 = inlined_call_operand.vmem [shape: bf16[2,324], index: 1, kind: output, shape index: {}]  }
   0x1   :  { %v4_v0 = vld [vmem:[%s56_s0] ss:$0 sm:$0xff]  ;;  %v29_v1 = vld [vmem:[%s56_s0 + $0x1] ss:$0 sm:$0xff] }
   0x2   :  { %v5_v2 = vunpack.i.l.bf16 %v4_v0  ;;  %v14_v3 = vunpack.i.h.bf16 %v4_v0  ;;  %v21_v4 = vunpack.i.l.bf16 %v29_v1 }
   0x4   :  { %v9_v5 = vpack.c.bf16 0.0, %v5_v2  ;;  %v17_v6 = vpack.c.bf16 0.0, %v14_v3  ;;  %v26_v7 = vpack.c.bf16 0.0, %v21_v4 }
   0x6   :  { %10 = vst [vmem:[%s57_s1] sm:$0x1] %v9_v5 }
   0x7   :  { %28 = vst [vmem:[%s57_s1 + $0x1] sm:$0x1] %v17_v6 }
   0x8   :  { %30 = vst [vmem:[%s57_s1 + $0x2] sm:$0x1] %v26_v7 }

// kernel: weighted_convolution_forward.1
= control target key start
LH: loop header
LB: loop body
LE: loop exit
PB: predicated region body
PF: predicated region fallthrough
CT: control target
= control target key end

     0   :  { %s804_s15 = smov 0   ;;  %s906_s0 = inlined_call_operand.vmem [shape: bf16[9,8,4], index: 0, kind: input, shape index: {}]   ;;  %s907_s1 = inlined_call_operand.vmem [shape: bf16[6,4,256], index: 1, kind: input, shape index: {}]   ;;  %s908_s2 = inlined_call_operand.vmem [shape: bf16[1,768], index: 2, kind: input, shape index: {}]   ;;  %s909_s3 = inlined_call_operand.vmem [shape: bf16[8,768], index: 3, kind: output, shape index: {0}]   ;;  %s910_s4 = inlined_call_operand.vmem [shape: f32[8,768], index: 4, kind: output, shape index: {1}]  }
   0x1 LB: > { %s706_s16 = sadd.s32 4294967295, %s768_s15   ;;  %p710_p0 = scmp.ge.s32.totalorder %s768_s15, 1  ;;  %s768_s15 = sphi %s804_s15, %s15_s15  }
   0x2   : > { %p173_p1 = scmp.lt.s32.totalorder %s768_s15, 7 }
   0x4   : > { %p174_p2 = pnand %p710_p0, %p173_p1 }
   0x5   : > { %p205_p3 = scmp.lt.s32.totalorder (!%p174_p2), %s706_s16, 5  ;;  %s770_s21 = smov (!%p174_p2), 127  }
   0x6   : > { %177 = sbr.rel (%p174_p2) target bundleno = 705 (0x2c1), region = 32  ;;  %s771_s22 = smov (!%p174_p2), 126  }
   0x7   : > { %s772_s23 = smov (!%p174_p2), 110   ;;  %s773_s24 = smov (!%p174_p2), 109  }
   0x8   : > { %s774_s25 = smov (!%p174_p2), 92   ;;  %s775_s26 = smov (!%p174_p2), 91  }
   0x9   : > { %s776_s27 = smov (!%p174_p2), 108   ;;  %s777_s28 = smov (!%p174_p2), 90  }
   0xa   : > { %s778_s6 = smov (!%p174_p2), 1.0  }
   0xb   : > { %s912_s16 = smov (!%p205_p3, %s706_s16), 5  ;;  %vm228_vm0 = vcmask 1041408   ;;  %v223_v27 = vld [vmem:[%s906_s0] sm:$0xf]  ;;  %vm224_vm1 = vcmask 31744   ;;  %vm259_vm2 = vcmask 1039360  }
   0xc   : > { %s734_s17 = sshll.u32 %s912_s16, 2  ;;  %v716_v31 = vld [vmem:[%s906_s0 + $0x4] sm:$0xf]  ;;  %vm296_vm3 = vcmask 1031168   ;;  %v718_v37 = vld [vmem:[%s906_s0 + $0x8] sm:$0xf]  ;;  %s212_s13 = scalar_lea.vmem %s908_s2, %s912_s16 }
   0xd   : > { %s820_s20 = scalar_lea.vmem %s907_s1, %s734_s17  ;;  %vm333_vm4 = vcmask 900096   ;;  %v720_v41 = vld [vmem:[%s906_s0 + $0xc] sm:$0xf]  ;;  %vm370_vm5 = vcmask 891904   ;;  %v855_v43 = vld [vmem:[%s212_s13] sm:$0x1]  ;;  %s216_s29 = scalar_lea.vmem %s909_s3, %s734_s17 }
   0xe   : > { %v246_v0 = vld [vmem:[%s820_s20] sm:$0xf]  ;;  %vm547_vm6 = vcmask 1040384   ;;  %v546_v44 = vunpack.c.l.bf16 %v855_v43  ;;  %v722_v50 = vld [vmem:[%s906_s0 + $0x10] sm:$0xf]  ;;  %vm444_vm7 = vcmask 752640  }
   0xf   : > { %250 = vst [vmem:[#allocation1] ss:$4 sm:$0xff] %v246_v0  ;;  %v283_v1 = vld [vmem:[%s820_s20] sm:$0xf]  ;;  %v726_v54 = vld [vmem:[%s906_s0 + $0x18] sm:$0xf] }
  0x10   : > { %v320_v4 = vld [vmem:[%s820_s20] sm:$0xf]  ;;  %v548_v47 = vsel %vm547_vm6, %v546_v44, 0.0  ;;  %vm481_vm8 = vcmask 744448   ;;  %v728_v60 = vld [vmem:[%s906_s0 + $0x1c] sm:$0xf] }
  0x11   : > { %v357_v7 = vld [vmem:[%s820_s20] sm:$0xf]  ;;  %vm407_vm9 = vcmask 883712   ;;  %vm518_vm10 = vcmask 736256   ;;  %s714_s10 = sshll.u32 %s912_s16, 3 }
  0x12   : > { %v394_v10 = vld [vmem:[%s820_s20] sm:$0xf]  ;;  %s220_s14 = scalar_lea.vmem %s910_s4, %s714_s10 }
  0x13   : > { %v431_v13 = vld [vmem:[%s820_s20] sm:$0xf] }
  0x14   : > { %v468_v16 = vld [vmem:[%s820_s20] sm:$0xf] }
  0x15   : > { %v505_v19 = vld [vmem:[%s820_s20] sm:$0xf] }
  0x16   : > { %v251_v2 = vld.sshfl [vmem:[#allocation1] sm:$0xff pattern:$0x73625140]  ;;  %v253_v3 = vld.sshfl [vmem:[#allocation1 + $0x8] sm:$0xff pattern:$0x73625140] }
  0x17   : > { %287 = vst [vmem:[#allocation1] ss:$4 sm:$0xff] %v283_v1  ;;  %255 = vrot.lane.b32.xlu2 %v251_v2, %s770_s21  ;;  %v222_v25 = vld [vmem:[%s820_s20] sm:$0x3] }
  0x18   : > { %v230_v26 = vsel %vm228_vm0, %v222_v25, 0 }
  0x19   : > { %239 = vmatpush.bf16.msra.mxu0 %v230_v26 }
  0x1c   : > { %715 = vmatmul.msk.bf16.vlgmr.msra.gmra.mxu0 %vm224_vm1, %v223_v27 }
  0x1e   : > { %v288_v5 = vld.sshfl [vmem:[#allocation1] sm:$0xff pattern:$0x73625140]  ;;  %v290_v6 = vld.sshfl [vmem:[#allocation1 + $0x8] sm:$0xff pattern:$0x73625140] }
  0x1f   : > { %292 = vrot.lane.b32.xlu0 %v288_v5, %s771_s22  ;;  %324 = vst [vmem:[#allocation1] ss:$4 sm:$0xff] %v320_v4  ;;  %257 = vrot.lane.b32.xlu2 %v253_v3, %s770_s21  ;;  %v724_v4 = vld [vmem:[%s906_s0 + $0x14] sm:$0xf]  ;;  %v730_v5 = vld [vmem:[%s906_s0 + $0x20] sm:$0xf] }
  0x26   : > { %v325_v8 = vld.sshfl [vmem:[#allocation1] sm:$0xff pattern:$0x73625140]  ;;  %v327_v9 = vld.sshfl [vmem:[#allocation1 + $0x8] sm:$0xff pattern:$0x73625140] }
  0x27   : > { %329 = vrot.lane.b32.xlu1 %v325_v8, %s772_s23  ;;  %294 = vrot.lane.b32.xlu0 %v290_v6, %s771_s22  ;;  %361 = vst [vmem:[#allocation1] ss:$4 sm:$0xff] %v357_v7 }
  0x2e   : > { %v364_v11 = vld.sshfl [vmem:[#allocation1 + $0x8] sm:$0xff pattern:$0x73625140]  ;;  %v362_v12 = vld.sshfl [vmem:[#allocation1] sm:$0xff pattern:$0x73625140] }
  0x2f   : > { %331 = vrot.lane.b32.xlu1 %v327_v9, %s772_s23  ;;  %366 = vrot.lane.b32.xlu0 %v362_v12, %s773_s24  ;;  %398 = vst [vmem:[#allocation1] ss:$4 sm:$0xff] %v394_v10 }
  0x36   : > { %v399_v14 = vld.sshfl [vmem:[#allocation1] sm:$0xff pattern:$0x73625140]  ;;  %v401_v15 = vld.sshfl [vmem:[#allocation1 + $0x8] sm:$0xff pattern:$0x73625140] }
  0x37   : > { %368 = vrot.lane.b32.xlu1 %v364_v11, %s773_s24  ;;  %435 = vst [vmem:[#allocation1] ss:$4 sm:$0xff] %v431_v13 }
  0x3e   : > { %v438_v17 = vld.sshfl [vmem:[#allocation1 + $0x8] sm:$0xff pattern:$0x73625140]  ;;  %v436_v18 = vld.sshfl [vmem:[#allocation1] sm:$0xff pattern:$0x73625140] }
  0x3f   : > { %442 = vrot.lane.b32.xlu0 %v438_v17, %s774_s25  ;;  %472 = vst [vmem:[#allocation1] ss:$4 sm:$0xff] %v468_v16  ;;  %440 = vrot.lane.b32.xlu2 %v436_v18, %s774_s25 }
  0x46   : > { %v473_v20 = vld.sshfl [vmem:[#allocation1] sm:$0xff pattern:$0x73625140]  ;;  %v475_v21 = vld.sshfl [vmem:[#allocation1 + $0x8] sm:$0xff pattern:$0x73625140] }
  0x47   : > { %477 = vrot.lane.b32.xlu1 %v473_v20, %s775_s26  ;;  %509 = vst [vmem:[#allocation1] ss:$4 sm:$0xff] %v505_v19  ;;  %403 = vrot.lane.b32.xlu0 %v399_v14, %s776_s27 }
  0x48   : > { %479 = vrot.lane.b32.xlu2 %v475_v21, %s775_s26 }
  0x4e   : > { %v512_v22 = vld.sshfl [vmem:[#allocation1 + $0x8] sm:$0xff pattern:$0x73625140]  ;;  %v510_v23 = vld.sshfl [vmem:[#allocation1] sm:$0xff pattern:$0x73625140] }
  0x4f   : > { %405 = vrot.lane.b32.xlu1 %v401_v15, %s776_s27  ;;  %516 = vrot.lane.b32.xlu0 %v512_v22, %s777_s28 }
  0x50   : > { %514 = vrot.lane.b32.xlu2 %v510_v23, %s777_s28 }
  0x71   : > { %v256_v24 = vpop.permute.xlu2 %255 }
  0x79   : > { %v258_v28 = vpop.permute.xlu2 %257  ;;  %549 = vadd.xlane.f32.xlu1 %v548_v47 }
  0x7a   : > { %v260_v29 = vsel %vm259_vm2, %v256_v24, %v258_v28 }
  0x7b   : > { %v265_v30 = vsel %vm228_vm0, %v260_v29, 0 }
  0x7c   : > { %274 = vmatpush.bf16.msra.mxu1 %v265_v30 }
  0x7f   : > { %717 = vmatmul.msk.bf16.vlgmr.msra.gmra.mxu1 %vm224_vm1, %v716_v31 }
  0x91   : > { %v293_v32 = vpop.permute.xlu0 %292 }
  0x99   : > { %v330_v33 = vpop.permute.xlu1 %329  ;;  %v295_v34 = vpop.permute.xlu0 %294 }
  0x9a   : > { %v297_v35 = vsel %vm296_vm3, %v293_v32, %v295_v34  ;;  %v441_v48 = vpop.permute.xlu2 %440  ;;  %v241_v6 = vpop.f32.mrf.mxu0 }
  0x9b   : > { %v302_v36 = vsel %vm228_vm0, %v297_v35, 0  ;;  %v559_v35 = vperm.slane %v546_v44, 0 }
  0x9c   : > { %311 = vmatpush.bf16.msra.mxu2 %v302_v36 }
  0x9f   : > { %719 = vmatmul.msk.bf16.vlgmr.msra.gmra.mxu2 %vm224_vm1, %v718_v37 }
  0xa1   : > { %v332_v38 = vpop.permute.xlu1 %331  ;;  %v367_v42 = vpop.permute.xlu0 %366 }
  0xa2   : > { %v334_v39 = vsel %vm333_vm4, %v330_v33, %v332_v38  ;;  %v480_v55 = vpop.permute.xlu2 %479  ;;  %v243_v7 = vpop.f32.mrf.mxu0 }
  0xa3   : > { %v339_v40 = vsel %vm228_vm0, %v334_v39, 0  ;;  %v601_v7 = vlaneseq }
  0xa4   : > { %348 = vmatpush.bf16.msra.mxu3 %v339_v40 }
  0xa7   : > { %721 = vmatmul.msk.bf16.vlgmr.msra.gmra.mxu3 %vm224_vm1, %v720_v41 }
  0xa9   : > { %v369_v45 = vpop.permute.xlu1 %368 }
  0xaa   : > { %v371_v46 = vsel %vm370_vm5, %v367_v42, %v369_v45  ;;  %v515_v61 = vpop.permute.xlu2 %514 }
  0xab   : > { %v376_v49 = vsel %vm228_vm0, %v371_v46, 0 }
  0xac   : > { %385 = vmatpush.bf16.msrb.mxu0 %v376_v49 }
  0xaf   : > { %723 = vmatmul.msk.bf16.vlgmr.msrb.gmra.mxu0 %vm224_vm1, %v722_v50 }
  0xb1   : > { %v443_v51 = vpop.permute.xlu0 %442 }
  0xb2   : > { %v445_v52 = vsel %vm444_vm7, %v441_v48, %v443_v51 }
  0xb3   : > { %v450_v53 = vsel %vm228_vm0, %v445_v52, 0 }
  0xb4   : > { %459 = vmatpush.bf16.msrb.mxu2 %v450_v53 }
  0xb7   : > { %727 = vmatmul.msk.bf16.vlgmr.msrb.gmra.mxu2 %vm224_vm1, %v726_v54 }
  0xb9   : > { %v478_v56 = vpop.permute.xlu1 %477  ;;  %v404_v57 = vpop.permute.xlu0 %403 }
  0xba   : > { %v482_v58 = vsel %vm481_vm8, %v478_v56, %v480_v55 }
  0xbb   : > { %v487_v59 = vsel %vm228_vm0, %v482_v58, 0 }
  0xbc   : > { %496 = vmatpush.bf16.msrb.mxu3 %v487_v59 }
  0xbf   : > { %729 = vmatmul.msk.bf16.vlgmr.msrb.gmra.mxu3 %vm224_vm1, %v728_v60 }
  0xc1   : > { %v406_v62 = vpop.permute.xlu1 %405  ;;  %v517_v63 = vpop.permute.xlu0 %516 }
  0xc2   : > { %v408_v0 = vsel %vm407_vm9, %v404_v57, %v406_v62  ;;  %v519_v1 = vsel %vm518_vm10, %v515_v61, %v517_v63 }
  0xc3   : > { %v413_v2 = vsel %vm228_vm0, %v408_v0, 0  ;;  %v524_v3 = vsel %vm228_vm0, %v519_v1, 0 }
  0xc4   : > { %422 = vmatpush.bf16.msrb.mxu1 %v413_v2  ;;  %533 = vmatpush.bf16.msra.mxu0 %v524_v3 }
  0xc7   : > { %725 = vmatmul.msk.bf16.vlgmr.msrb.gmra.mxu1 %vm224_vm1, %v724_v4  ;;  %731 = vmatmul.msk.bf16.vlgmr.msra.gmra.mxu0 %vm224_vm1, %v730_v5 }
  0xec   : > { %v550_v14 = vpop.xlane.xlu1 %549 }
  0xed   : > { %v551_v15 = vrot.slane %v550_v14, 4 }
  0xef   : > { %v552_v17 = vadd.f32 %v551_v15, %v550_v14 }
  0xf1   : > { %v553_v19 = vrot.slane %v552_v17, 2 }
  0xf3   : > { %v554_v20 = vadd.f32 %v553_v19, %v552_v17 }
  0xf5   : > { %v555_v22 = vrot.slane %v554_v20, 1 }
  0xf7   : > { %v556_v24 = vadd.f32 %v555_v22, %v554_v20 }
  0xf9   : > { %735 = vpush %v556_v24 }
  0xfc   : > { %v276_v8 = vpop.f32.mrf.mxu1 }
  0xfd   : > { %v281_v21 = vadd.f32 %v276_v8, %v241_v6  ;;  %v602_v8 = vshrl.u32 %v601_v7, 7 }
  0xff   : > { %vm605_vm15 = vcmp.eq.s32.totalorder %v602_v8, 2  ;;  %vm604_vm0 = vcmp.eq.s32.totalorder %v602_v8, 1  ;;  %vm603_vm1 = vcmp.eq.s32.totalorder %v602_v8, 0 }
 0x104   : > { %v278_v9 = vpop.f32.mrf.mxu1 }
 0x122   : > { %v313_v10 = vpop.f32.mrf.mxu2 }
 0x123   : > { %v318_v25 = vadd.f32 %v313_v10, %v281_v21 }
 0x12a   : > { %v350_v11 = vpop.f32.mrf.mxu3  ;;  %v315_v12 = vpop.f32.mrf.mxu2  ;;  %s892_s30 = spop %735 }
 0x12b   : > { %v355_v26 = vadd.f32 %v350_v11, %v318_v25  ;;  %s558_s5 = smul.f32 8.0, %s892_s30 }
 0x12c   : > { %v387_v13 = vpop.f32.mrf.mxu0 }
 0x12d   : > { %v392_v29 = vadd.f32 %v387_v13, %v355_v26  ;;  %s570_s7 = smax.f32 %s778_s6, %s558_s5  ;;  %v606_v9 = vstv %s558_s5 }
 0x12e   : > { %v571_v42 = vstv %s570_s7  ;;  %v607_v10 = vsel %vm605_vm15, %v606_v9, 0.0 }
 0x12f   : > { %760 = vrcp.f32 %v571_v42  ;;  %vm577_vm11 = vweird.f32 %v571_v42  ;;  %v583_v51 = vand.u32 2147483648, %v571_v42  ;;  %v581_v53 = vand.u32 2147483647, %v571_v42 }
 0x131   : > { %v584_v56 = vor.u32 1.1754944e-38, %v583_v51  ;;  %vm582_vm14 = vcmp.eq.f32.partialorder %v581_v53, 8.507059e+37 }
 0x132   : > { %v352_v16 = vpop.f32.mrf.mxu3 }
 0x134   : > { %v389_v18 = vpop.f32.mrf.mxu0 }
 0x135   : > { %v761_v43 = vpop.eup %760 }
 0x136   : > { %v573_v44 = vmul.f32 %v761_v43, %v571_v42  ;;  %vm578_vm12 = vweird.f32 %v761_v43 }
 0x137   : > { %vm579_vm13 = vmor %vm577_vm11, %vm578_vm12 }
 0x138   : > { %v574_v45 = vsub.f32 1.0, %v573_v44 }
 0x13a   : > { %v461_v23 = vpop.f32.mrf.mxu2  ;;  %v575_v48 = vmul.f32 %v761_v43, %v574_v45 }
 0x13c   : > { %v576_v52 = vadd.f32 %v761_v43, %v575_v48 }
 0x13e   : > { %v580_v57 = vsel %vm579_vm13, %v761_v43, %v576_v52 }
 0x13f   : > { %v585_v59 = vsel %vm582_vm14, %v584_v56, %v580_v57 }
 0x142   : > { %v498_v27 = vpop.f32.mrf.mxu3  ;;  %v463_v28 = vpop.f32.mrf.mxu2 }
 0x144   : > { %v424_v30 = vpop.f32.mrf.mxu1  ;;  %v535_v31 = vpop.f32.mrf.mxu0 }
 0x145   : > { %v429_v32 = vadd.f32 %v424_v30, %v392_v29 }
 0x147   : > { %v466_v33 = vadd.f32 %v461_v23, %v429_v32 }
 0x149   : > { %v503_v34 = vadd.f32 %v498_v27, %v466_v33 }
 0x14a   : > { %v500_v36 = vpop.f32.mrf.mxu3 }
 0x14b   : > { %v540_v37 = vadd.f32 %v535_v31, %v503_v34 }
 0x14c   : > { %v426_v38 = vpop.f32.mrf.mxu1  ;;  %v537_v39 = vpop.f32.mrf.mxu0 }
 0x14d   : > { %v543_v40 = vpack.c.bf16 %v540_v37, %v540_v37  ;;  %v560_v41 = vmul.f32 %v559_v35, %v540_v37 }
 0x14f   : > { %544 = vst [vmem:[%s216_s29] sm:$0xf] %v543_v40  ;;  %561 = vadd.xlane.f32.xlu2 %v560_v41 }
 0x1c2   : > { %v562_v46 = vpop.xlane.xlu2 %561 }
 0x1c3   : > { %v563_v47 = vrot.slane %v562_v46, 4 }
 0x1c5   : > { %v564_v49 = vadd.f32 %v563_v47, %v562_v46 }
 0x1c7   : > { %v565_v50 = vrot.slane %v564_v49, 2 }
 0x1c9   : > { %v566_v54 = vadd.f32 %v565_v50, %v564_v49 }
 0x1cb   : > { %v567_v55 = vrot.slane %v566_v54, 1 }
 0x1cd   : > { %v568_v58 = vadd.f32 %v567_v55, %v566_v54 }
 0x1cf   : > { %737 = vpush %v568_v58 }
 0x1d0   : > { %739 = vpush %v585_v59 }
 0x200   : > { %s738_s17 = spop %737 }
 0x201   : > { %s740_s8 = spop %739  ;;  %v610_v12 = vstv %s738_s17 }
 0x202   : > { %s587_s9 = smul.f32 %s740_s8, %s738_s17 }
 0x204   : > { %v588_v60 = vstv %s587_s9 }
 0x205   : > { %v589_v61 = vsub.f32 %v540_v37, %v588_v60 }
 0x207   : > { %v590_v62 = vmul.f32 %v589_v61, %v559_v35 }
 0x209   : > { %v591_v63 = vmul.f32 %v590_v62, %v590_v62 }
 0x20b   : > { %592 = vadd.xlane.f32.xlu0 %v591_v63 }
 0x27e   : > { %v593_v0 = vpop.xlane.xlu0 %592 }
 0x27f   : > { %v594_v1 = vrot.slane %v593_v0, 4 }
 0x281   : > { %v595_v2 = vadd.f32 %v594_v1, %v593_v0 }
 0x283   : > { %v596_v3 = vrot.slane %v595_v2, 2 }
 0x285   : > { %v597_v4 = vadd.f32 %v596_v3, %v595_v2 }
 0x287   : > { %v598_v5 = vrot.slane %v597_v4, 1 }
 0x289   : > { %v599_v6 = vadd.f32 %v598_v5, %v597_v4 }
 0x28b   : > { %741 = vpush %v599_v6 }
 0x2bc   : > { %s742_s11 = spop %741 }
 0x2bd   : > { %v608_v11 = vstv %s742_s11 }
 0x2be   : > { %v609_v13 = vsel %vm604_vm0, %v608_v11, %v607_v10 }
 0x2bf   : > { %v611_v14 = vsel %vm603_vm1, %v610_v12, %v609_v13 }
 0x2c0   : > { %612 = vst [vmem:[%s220_s14] sm:$0xff] %v611_v14 }
 0x2c1 PF: > { %s15_s15 = sadd.s32 1, %s768_s15  }
 0x2c2   : > { %p12_p4 = scmp.ge.s32.totalorder %s15_s15, 8  }
 0x2c4   :  { %14 = sbr.rel (!%p12_p4) target bundleno = 1 (0x1), region = 85 }

</bundles_post_ra>
